<compile_context>
chip_gen: v7x
topology: tpu7x:2x2x1
jax: 0.10.0
libtpu: 0.0.40
codegen_flags: <defaults>
</compile_context>

<pallas_src>
import functools
import math

import jax
import jax.numpy as jnp
from jax.experimental import pallas as pl
from jax.experimental.pallas import tpu as pltpu


def _round_up(x, m):
    return ((x + m - 1) // m) * m


def _vmem_limit(bytes_estimate):
    # explicit scoped-VMEM limit: 2x headroom, clamped to [16 MiB, 32 MiB]
    # (safe on v5e/v6e/v7x; well under v7x's 64 MiB physical VMEM).
    return int(min(max(2 * bytes_estimate + (2 << 20), 16 << 20), 32 << 20))


def _pad_rows(x2d, rows):
    m = x2d.shape[0]
    if rows == m:
        return x2d
    return jnp.pad(x2d, ((0, rows - m), (0, 0)))


# ----------------------------------------------------------------------------
# Kernel 1: fused QKV projection
# ----------------------------------------------------------------------------
def _qkv_kernel(x_ref, w_ref, b_ref, o_ref):
    # x_ref: (tm, H); w_ref: (H, 3H) = [Wq^T | Wk^T | Wv^T]; b_ref: (1, 3H)
    # matmul in the native input dtype, f32 accumulation on the MXU
    y = jnp.dot(x_ref[...], w_ref[...], preferred_element_type=jnp.float32)
    y = y + b_ref[...].astype(jnp.float32)
    o_ref[...] = y.astype(o_ref.dtype)


def _qkv_projection(x2d, w_qkv, b_qkv, *, tm):
    M, H = x2d.shape            # M is already padded to a multiple of tm
    H3 = w_qkv.shape[1]
    grid_m = pl.cdiv(M, tm)
    est = 4 * (2 * tm * H + 2 * tm * H3 + 2 * H * H3 + H3)
    return pl.pallas_call(
        _qkv_kernel,
        out_shape=jax.ShapeDtypeStruct((M, H3), x2d.dtype),
        grid_spec=pltpu.PrefetchScalarGridSpec(
            num_scalar_prefetch=0,
            grid=(grid_m,),
            in_specs=[
                pl.BlockSpec((tm, H), lambda i: (i, 0)),    # activation tile
                pl.BlockSpec((H, H3), lambda i: (0, 0)),    # resident fused weight
                pl.BlockSpec((1, H3), lambda i: (0, 0)),    # fused bias
            ],
            out_specs=pl.BlockSpec((tm, H3), lambda i: (i, 0)),
        ),
        compiler_params=pltpu.CompilerParams(
            dimension_semantics=("parallel",),
            vmem_limit_bytes=_vmem_limit(est)),
    )(x2d, w_qkv, b_qkv)


# ----------------------------------------------------------------------------
# Kernel 2: attention core (one grid step per (batch, head))
# ----------------------------------------------------------------------------
def _attn_kernel(q_ref, k_ref, v_ref, bias_ref, o_ref, *, scale, alpha):
    # q/k/v refs: (1, S, D); bias ref: (1, S, S)
    q = q_ref[0].astype(jnp.float32) * scale
    k = k_ref[0].astype(jnp.float32)
    v = v_ref[0].astype(jnp.float32)
    # q @ k^T without an explicit in-kernel transpose
    scores = jax.lax.dot_general(
        q, k, (((1,), (1,)), ((), ())),
        preferred_element_type=jnp.float32) + bias_ref[0]
    # CogView PB-Relax softmax (exactly as in the PyTorch module; alpha=32 is a
    # power of two so this is bit-identical to a standard stable softmax)
    scaled = scores / alpha
    mx = jnp.max(scaled, axis=-1, keepdims=True)
    e = jnp.exp((scaled - mx) * alpha)
    probs = e / jnp.sum(e, axis=-1, keepdims=True)
    # dropout(attention_probs) is identity at inference
    # TODO(synk): head_mask multiply and output_attentions (returning probs)
    #             are not implemented; pass head_mask=None.
    ctx = jnp.dot(probs, v, preferred_element_type=jnp.float32)
    o_ref[0] = ctx.astype(o_ref.dtype)


def _attention_core(qh, kh, vh, bias, *, scale, alpha):
    BH, S, D = qh.shape
    est = 4 * 2 * (3 * S * D + 2 * S * S + S * D)
    kern = functools.partial(_attn_kernel, scale=scale, alpha=alpha)
    return pl.pallas_call(
        kern,
        out_shape=jax.ShapeDtypeStruct((BH, S, D), qh.dtype),
        grid_spec=pltpu.PrefetchScalarGridSpec(
            num_scalar_prefetch=0,
            grid=(BH,),
            in_specs=[
                pl.BlockSpec((1, S, D), lambda i: (i, 0, 0)),
                pl.BlockSpec((1, S, D), lambda i: (i, 0, 0)),
                pl.BlockSpec((1, S, D), lambda i: (i, 0, 0)),
                pl.BlockSpec((1, S, S), lambda i: (i, 0, 0)),
            ],
            out_specs=pl.BlockSpec((1, S, D), lambda i: (i, 0, 0)),
        ),
        compiler_params=pltpu.CompilerParams(
            dimension_semantics=("parallel",),
            vmem_limit_bytes=_vmem_limit(est)),
    )(qh, kh, vh, bias)


# ----------------------------------------------------------------------------
# Kernel 3: self-output = dense + (dropout=identity) + residual + LayerNorm
# ----------------------------------------------------------------------------
def _self_output_kernel(x_ref, res_ref, w_ref, b_ref, g_ref, be_ref, o_ref, *,
                        eps):
    # dense in native dtype with f32 accumulation
    y = jnp.dot(x_ref[...], w_ref[...], preferred_element_type=jnp.float32)
    # bias + residual fused into one f32 add chain
    z = y + b_ref[...].astype(jnp.float32) + res_ref[...].astype(jnp.float32)
    mean = jnp.mean(z, axis=-1, keepdims=True)
    c = z - mean
    var = jnp.mean(c * c, axis=-1, keepdims=True)
    out = c * jax.lax.rsqrt(var + eps)
    out = out * g_ref[...].astype(jnp.float32) + be_ref[...].astype(jnp.float32)
    o_ref[...] = out.astype(o_ref.dtype)


def _self_output(ctx2d, res2d, w_out_t, b2d, g2d, be2d, *, eps, tm):
    M, H = res2d.shape          # M is already padded to a multiple of tm
    grid_m = pl.cdiv(M, tm)
    est = 4 * (6 * tm * H + 2 * H * H + 3 * H)
    kern = functools.partial(_self_output_kernel, eps=eps)
    return pl.pallas_call(
        kern,
        out_shape=jax.ShapeDtypeStruct((M, H), res2d.dtype),
        grid_spec=pltpu.PrefetchScalarGridSpec(
            num_scalar_prefetch=0,
            grid=(grid_m,),
            in_specs=[
                pl.BlockSpec((tm, H), lambda i: (i, 0)),   # context tile
                pl.BlockSpec((tm, H), lambda i: (i, 0)),   # residual tile
                pl.BlockSpec((H, H), lambda i: (0, 0)),    # resident Wo^T
                pl.BlockSpec((1, H), lambda i: (0, 0)),    # bias
                pl.BlockSpec((1, H), lambda i: (0, 0)),    # LayerNorm gamma
                pl.BlockSpec((1, H), lambda i: (0, 0)),    # LayerNorm beta
            ],
            out_specs=pl.BlockSpec((tm, H), lambda i: (i, 0)),
        ),
        compiler_params=pltpu.CompilerParams(
            dimension_semantics=("parallel",),
            vmem_limit_bytes=_vmem_limit(est)),
    )(ctx2d, res2d, w_out_t, b2d, g2d, be2d)


# ----------------------------------------------------------------------------
# Wrapper
# ----------------------------------------------------------------------------
def prepare_params(wq, bq, wk, bk, wv, bv, wo, bo, gamma, beta):
    """One-time parameter prep (keep OUTSIDE the per-call path): fuse the three
    QKV projections into a single (H, 3H) matmul operand and store the output
    projection pre-transposed as (H, H)."""
    H = wq.shape[1]
    w_qkv = jnp.concatenate([wq.T, wk.T, wv.T], axis=1)         # (H, 3H)
    b_qkv = jnp.concatenate([bq, bk, bv]).reshape(1, 3 * H)     # (1, 3H)
    return dict(
        w_qkv=w_qkv, b_qkv=b_qkv,
        w_out=wo.T, b_out=bo.reshape(1, H),
        gamma=gamma.reshape(1, H), beta=beta.reshape(1, H),
    )


def layoutlmv3_attention(hidden_states, params, *, num_heads,
                         attention_mask=None, rel_pos=None, rel_2d_pos=None,
                         eps=1e-5, alpha=32.0, tm=None):
    """Forward pass of LayoutLMv3Attention (eval mode)."""
    B, S, H = hidden_states.shape
    assert H % num_heads == 0
    hd = H // num_heads
    M = B * S

    # Row tile: ~256 rows for big problems (enables pipelining + megacore/2-TC
    # sharding), capped at the 8-aligned problem size for tiny inputs.
    if tm is None:
        tm = min(256, _round_up(M, 8))
    tm = _round_up(tm, 8)
    M_pad = _round_up(M, tm)          # pad rows instead of dropping tails

    x2d = hidden_states.reshape(M, H)

    # ---- 1) fused QKV projection (row tiled + padded) ----
    qkv = _qkv_projection(_pad_rows(x2d, M_pad), params["w_qkv"],
                          params["b_qkv"], tm=tm)[:M]
    q2d, k2d, v2d = qkv[:, :H], qkv[:, H:2 * H], qkv[:, 2 * H:]

    def to_heads(t):
        return (t.reshape(B, S, num_heads, hd)
                 .transpose(0, 2, 1, 3)
                 .reshape(B * num_heads, S, hd))

    qh, kh, vh = to_heads(q2d), to_heads(k2d), to_heads(v2d)

    # ---- combined additive attention bias ----
    # (rel_pos + rel_2d_pos) / sqrt(d)   +   additive attention_mask
    scale = 1.0 / math.sqrt(hd)
    bias = jnp.zeros((B, num_heads, S, S), jnp.float32)
    if rel_pos is not None:
        bias = bias + rel_pos.astype(jnp.float32) * scale
    if rel_2d_pos is not None:
        bias = bias + rel_2d_pos.astype(jnp.float32) * scale
    if attention_mask is not None:
        bias = bias + attention_mask.astype(jnp.float32)
    bias = bias.reshape(B * num_heads, S, S)

    # ---- 2) attention core ----
    ctxh = _attention_core(qh, kh, vh, bias, scale=scale, alpha=alpha)
    ctx2d = (ctxh.reshape(B, num_heads, S, hd)
                  .transpose(0, 2, 1, 3)
                  .reshape(M, H))

    # ---- 3) self-output: dense + residual + LayerNorm (row tiled + padded) ----
    # TODO(synk): training-mode dropout (attn-probs / hidden dropout) omitted —
    #             identity at inference.
    out2d = _self_output(_pad_rows(ctx2d, M_pad), _pad_rows(x2d, M_pad),
                         params["w_out"], params["b_out"],
                         params["gamma"], params["beta"],
                         eps=eps, tm=tm)[:M]
    return out2d.reshape(B, S, H)


# ----------------------------------------------------------------------------
# Pure-JAX reference (mirrors the PyTorch module, eval mode)
# ----------------------------------------------------------------------------
def _reference(hidden_states, wq, bq, wk, bk, wv, bv, wo, bo, gamma, beta,
               num_heads, attention_mask=None, rel_pos=None, rel_2d_pos=None,
               eps=1e-5, alpha=32.0):
    B, S, H = hidden_states.shape
    hd = H // num_heads
    lin = lambda x, w, b: jnp.einsum("bsh,oh->bso", x, w) + b
    q = lin(hidden_states, wq, bq)
    k = lin(hidden_states, wk, bk)
    v = lin(hidden_states, wv, bv)
    split = lambda t: t.reshape(B, S, num_heads, hd).transpose(0, 2, 1, 3)
    q, k, v = split(q), split(k), split(v)
    scores = jnp.einsum("bhqd,bhkd->bhqk", q / math.sqrt(hd), k)
    if rel_pos is not None:
        scores = scores + rel_pos / math.sqrt(hd)
    if rel_2d_pos is not None:
        scores = scores + rel_2d_pos / math.sqrt(hd)
    if attention_mask is not None:
        scores = scores + attention_mask
    scaled = scores / alpha
    mx = scaled.max(-1, keepdims=True)
    e = jnp.exp((scaled - mx) * alpha)
    probs = e / e.sum(-1, keepdims=True)
    ctx = jnp.einsum("bhqk,bhkd->bhqd", probs, v)
    ctx = ctx.transpose(0, 2, 1, 3).reshape(B, S, H)
    y = jnp.einsum("bsh,oh->bso", ctx, wo) + bo
    z = y + hidden_states
    mean = z.mean(-1, keepdims=True)
    var = ((z - mean) ** 2).mean(-1, keepdims=True)
    return (z - mean) * jax.lax.rsqrt(var + eps) * gamma + beta


if __name__ == "__main__":
    # Small config: hidden_size=32, num_attention_heads=4, seq=8, batch=2
    B, S, H, NH = 2, 8, 32, 4
    eps = 1e-5

    key = jax.random.PRNGKey(0)
    ks = jax.random.split(key, 11)
    hidden_states = jax.random.normal(ks[0], (B, S, H), dtype=jnp.float32)

    init = lambda k, shape: 0.05 * jax.random.normal(k, shape, dtype=jnp.float32)
    wq, wk, wv, wo = (init(ks[1], (H, H)), init(ks[2], (H, H)),
                      init(ks[3], (H, H)), init(ks[4], (H, H)))
    bq, bk, bv, bo = (init(ks[5], (H,)), init(ks[6], (H,)),
                      init(ks[7], (H,)), init(ks[8], (H,)))
    gamma = 1.0 + 0.01 * jax.random.normal(ks[9], (H,), dtype=jnp.float32)
    beta = 0.01 * jax.random.normal(ks[10], (H,), dtype=jnp.float32)

    # HF-style additive attention mask: mask out the last 2 keys of batch 1.
    keep = jnp.ones((B, S), jnp.float32).at[1, S - 2:].set(0.0)
    attention_mask = (1.0 - keep)[:, None, None, :] * -1e9

    params = prepare_params(wq, bq, wk, bk, wv, bv, wo, bo, gamma, beta)

    out = layoutlmv3_attention(hidden_states, params, num_heads=NH,
                               attention_mask=attention_mask, eps=eps)
    out = jax.block_until_ready(out)

    ref = _reference(hidden_states, wq, bq, wk, bk, wv, bv, wo, bo, gamma, beta,
                     NH, attention_mask=attention_mask, eps=eps)
    assert out.shape == (B, S, H)
    assert jnp.allclose(out, ref, atol=1e-4, rtol=1e-4), "mismatch vs reference"

    print("KERNEL_OK")
</pallas_src>

<mosaic_0001>
module attributes {stable_mosaic.version = 11 : i64} {
  func.func @_qkv_kernel(%arg0: i32, %arg1: memref<16x32xf32, #tpu.memory_space<vmem>>, %arg2: memref<32x96xf32, #tpu.memory_space<vmem>>, %arg3: memref<1x96xf32, #tpu.memory_space<vmem>>, %arg4: memref<16x96xf32, #tpu.memory_space<vmem>>) attributes {dimension_semantics = [#tpu.dimension_semantics<parallel>], iteration_bounds = array<i64: 1>, scalar_prefetch = 0 : i64, scratch_operands = 0 : i64, tpu.core_type = #tpu.core_type<tc>, window_params = [{transform_indices = @transform_0, window_bounds = array<i64: 16, 32>}, {pipeline_mode = #tpu.pipeline_mode<synchronous>, transform_indices = @transform_1, window_bounds = array<i64: 32, 96>}, {pipeline_mode = #tpu.pipeline_mode<synchronous>, transform_indices = @transform_2, window_bounds = array<i64: 1, 96>}, {transform_indices = @transform_3, window_bounds = array<i64: 16, 96>}]} {
    %c0 = arith.constant 0 : index
    %c0_0 = arith.constant 0 : index
    %0 = vector.load %arg1[%c0, %c0_0] : memref<16x32xf32, #tpu.memory_space<vmem>>, vector<16x32xf32>
    %c0_1 = arith.constant 0 : index
    %c0_2 = arith.constant 0 : index
    %1 = vector.load %arg2[%c0_1, %c0_2] : memref<32x96xf32, #tpu.memory_space<vmem>>, vector<32x96xf32>
    %cst = arith.constant dense<0.000000e+00> : vector<16x96xf32>
    %2 = tpu.matmul %0, %1, %cst {dimension_numbers = #tpu.dot_dimension_numbers<[1], [0], [0], [1], [0, 0, 1, 1], [], []>} : vector<16x32xf32>, vector<32x96xf32>, vector<16x96xf32> -> vector<16x96xf32>
    %c0_3 = arith.constant 0 : index
    %c0_4 = arith.constant 0 : index
    %3 = vector.load %arg3[%c0_3, %c0_4] : memref<1x96xf32, #tpu.memory_space<vmem>>, vector<1x96xf32>
    %4 = vector.broadcast %3 : vector<1x96xf32> to vector<16x96xf32>
    %5 = arith.addf %2, %4 : vector<16x96xf32>
    %c0_5 = arith.constant 0 : index
    %c0_6 = arith.constant 0 : index
    %6 = vector.load %arg4[%c0_5, %c0_6] : memref<16x96xf32, #tpu.memory_space<vmem>>, vector<16x96xf32>
    tpu.vector_store %arg4[%c0_5, %c0_6], %5 {strides = array<i32>} : memref<16x96xf32, #tpu.memory_space<vmem>>, vector<16x96xf32>,
    return
  }
  func.func @transform_0(%arg0: i32) -> (i32, i32) {
    %c0_i32 = arith.constant 0 : i32
    %c0_i32_0 = arith.constant 0 : i32
    return %arg0, %c0_i32 : i32, i32
  }
  func.func @transform_1(%arg0: i32) -> (i32, i32) {
    %c0_i32 = arith.constant 0 : i32
    %c0_i32_0 = arith.constant 0 : i32
    %c0_i32_1 = arith.constant 0 : i32
    return %c0_i32, %c0_i32_0 : i32, i32
  }
  func.func @transform_2(%arg0: i32) -> (i32, i32) {
    %c0_i32 = arith.constant 0 : i32
    %c0_i32_0 = arith.constant 0 : i32
    %c0_i32_1 = arith.constant 0 : i32
    return %c0_i32, %c0_i32_0 : i32, i32
  }
  func.func @transform_3(%arg0: i32) -> (i32, i32) {
    %c0_i32 = arith.constant 0 : i32
    %c0_i32_0 = arith.constant 0 : i32
    return %arg0, %c0_i32 : i32, i32
  }
}

</mosaic_0001>

<bundles_post_ra>
// kernel: tpu_custom_call.1
= control target key start
LH: loop header
LB: loop body
LE: loop exit
PB: predicated region body
PF: predicated region fallthrough
CT: control target
= control target key end

     0   :  { %8 = vsyncpa [#allocation3], 0  ;;  %s337_s0 = inlined_call_operand.hbm [shape: f32[16,32], index: 0, kind: input, shape index: {}]   ;;  %s338_s1 = inlined_call_operand.hbm [shape: f32[32,96], index: 1, kind: input, shape index: {}]   ;;  %s339_s2 = inlined_call_operand.vmem [shape: f32[1,96], index: 2, kind: input, shape index: {}]   ;;  %s340_s3 = inlined_call_operand.hbm [shape: f32[16,96], index: 3, kind: output, shape index: {}]  }
   0x1   :  { %9 = vsyncpa [#allocation6], 0 }
   0x2   :  { %10 = vsyncpa [#allocation4], 0  ;;  %s264_s12 = smov [#allocation2]   ;;  %s192_s16 = scalar_lea.hbm %s337_s0, 256 }
   0x3   :  { %s16_s13 = sshll.u32 %s264_s12, 4  ;;  %p193_p0 = scmp.ne.s32.totalorder %s337_s0, %s192_s16  ;;  %s17_s13 = int_to_ptr.vmem [resolvable:$true] %s16_s13 }
   0x4   :  { %p196_p1 = scmp.lt.u32.totalorder %s192_s16, %s337_s0 }
   0x6   :  { %p198_p2 = pnand %p196_p1, %p193_p0 }
   0x8   :  { %201 = shalt.err (!%p198_p2)
}
   0x9   :  { %s202_s21 = scalar_lea.vmem %s17_s13, 256  ;;  %p207_p4 = scmp.lt.s32.totalorder %s17_s13, %s17_s13 }
   0xa   :  { %p203_p3 = scmp.ne.s32.totalorder %s17_s13, %s202_s21  ;;  %p208_p5 = scmp.lt.s32.totalorder %s202_s21, %s202_s21 }
   0xc   :  { %p209_p6 = por %p208_p5, %p207_p4 }
   0xe   :  { %p210_p7 = pnand %p209_p6, %p203_p3 }
  0x10   :  { %213 = shalt.err (!%p210_p7)
}
  0x11   :  { %s265_s22 = smov 128   ;;  %s266_s23 = smov 8  }
  0x12   :  { %22 = dma.hbm_to_vmem [thread:$0]  %s337_s0, 256, %s17_s13, [#allocation3], %s265_s22, %s265_s22, %s266_s23  }
  0x13   :  { %s267_s26 = smov [#allocation5]   ;;  %s214_s30 = scalar_lea.hbm %s338_s1, 512 }
  0x14   :  { %s28_s27 = sshll.u32 %s267_s26, 4  ;;  %p215_p8 = scmp.ne.s32.totalorder %s338_s1, %s214_s30  ;;  %s29_s27 = int_to_ptr.vmem [resolvable:$true] %s28_s27 }
  0x15   :  { %p218_p9 = scmp.lt.u32.totalorder %s214_s30, %s338_s1 }
  0x17   :  { %p220_p10 = pnand %p218_p9, %p215_p8 }
  0x19   :  { %223 = shalt.err (!%p220_p10)
}
  0x1a   :  { %s224_s8 = scalar_lea.vmem %s29_s27, 512  ;;  %p229_p12 = scmp.lt.s32.totalorder %s29_s27, %s29_s27 }
  0x1b   :  { %p225_p11 = scmp.ne.s32.totalorder %s29_s27, %s224_s8  ;;  %p230_p13 = scmp.lt.s32.totalorder %s224_s8, %s224_s8 }
  0x1d   :  { %p231_p0 = por %p230_p13, %p229_p12 }
  0x1f   :  { %p232_p1 = pnand %p231_p0, %p225_p11 }
  0x21   :  { %235 = shalt.err (!%p232_p1)
}
  0x22   :  { %34 = dma.hbm_to_vmem [thread:$0]  %s338_s1, 512, %s29_s27, [#allocation6], %s265_s22, %s265_s22, %s266_s23  }
  0x23   :  { %258 = dma.done.wait [#allocation3], 256  }
  0x24   :  { %259 = vsyncadd [#allocation3], 4294967040 }
  0x25   :  { %260 = dma.done.wait [#allocation6], 512  }
  0x26   :  { %261 = vsyncadd [#allocation6], 4294966784  ;;  %vm56_vm0 = vcmask 261120   ;;  %v45_v0 = vld [vmem:[#allocation5] sm:$0xff]  ;;  %v46_v1 = vld [vmem:[#allocation5 + $0x8] sm:$0xff]  ;;  %s268_s11 = smov [#allocation7]  }
  0x27   :  { %v47_v2 = vld [vmem:[#allocation5 + $0x10] sm:$0xff]  ;;  %v179_v3 = vpack.c.bf16 %v46_v1, %v45_v0  ;;  %v48_v4 = vld [vmem:[#allocation5 + $0x18] sm:$0xff]  ;;  %s146_s12 = sshll.u32 %s268_s11, 4  ;;  %vm138_vm1 = vcmask 785408   ;;  %s147_s12 = int_to_ptr.vmem [resolvable:$true] %s146_s12 }
  0x28   :  { %v43_v5 = vld [vmem:[#allocation2] sm:$0xff]  ;;  %v183_v6 = vpack.c.bf16 %v48_v4, %v47_v2  ;;  %v44_v7 = vld [vmem:[#allocation2 + $0x8] sm:$0xff]  ;;  %s236_s13 = scalar_lea.vmem %s147_s12, 256  ;;  %p241_p3 = scmp.lt.s32.totalorder %s147_s12, %s147_s12 }
  0x29   :  { %176 = vmatprep.mubr.msk.f32.mxu0 %vm56_vm0, %v43_v5  ;;  %180 = vmatprep.subr.bf16.mxu0 %v179_v3  ;;  %v159_v8 = vld [vmem:[%s339_s2] ss:$0 sm:$0xff]  ;;  %p237_p2 = scmp.ne.s32.totalorder %s147_s12, %s236_s13  ;;  %p242_p4 = scmp.lt.s32.totalorder %s236_s13, %s236_s13 }
  0x2a   :  { %182 = vmatpush3.bf16.msra.mxu0 %v179_v3 }
  0x2b   :  { %184 = vmatprep.subr.bf16.mxu0 %v183_v6  ;;  %p243_p5 = por %p242_p4, %p241_p3 }
  0x2d   :  { %p244_p6 = pnand %p243_p5, %p237_p2 }
  0x2e   :  { %186 = vmatpush3.bf16.msra.mxu0 %v183_v6 }
  0x31   :  { %177 = vmatmul.mubr.msk.f32.vlgmr.msra.gmra.mrb[0].mxu0 %vm56_vm0, %v44_v7 }
 0x104   :  { %v178_v9 = vpop.f32.mrb[0].mxu0 }
 0x105   :  { %v135_v10 = vadd.f32 %v178_v9, %v159_v8  ;;  %v129_v11 = vpop.f32.mrb[1].mxu0 }
 0x106   :  { %v130_v12 = vadd.f32 %v159_v8, %v129_v11 }
 0x107   :  { %140 = vst.msk [vmem:[#allocation7 + $0x8] sm:$0xff] %vm138_vm1, %v135_v10 }
 0x108   :  { %139 = vst.msk [vmem:[#allocation7] sm:$0xff] %vm138_vm1, %v130_v12 }
 0x109   :  { %247 = shalt.err (!%p244_p6)
}
 0x10a   :  { %s248_s2 = scalar_lea.hbm %s340_s3, 256 }
 0x10b   :  { %p249_p7 = scmp.ne.s32.totalorder %s340_s3, %s248_s2  ;;  %p252_p8 = scmp.lt.u32.totalorder %s248_s2, %s340_s3 }
 0x10d   :  { %p254_p9 = pnand %p252_p8, %p249_p7 }
 0x10f   :  { %257 = shalt.err (!%p254_p9)
}
 0x110   :  { %152 = dma.vmem_to_hbm [thread:$0]  %s147_s12, 256, %s340_s3, [#allocation4], %s265_s22, %s265_s22, %s266_s23  }
 0x111   :  { %262 = dma.done.wait [#allocation4], 256  }
 0x112   :  { %263 = vsyncadd [#allocation4], 4294967040 }
 0x113   :  { %156 = vsyncpa [#allocation3], 1 }
 0x114   :  { %157 = vsyncpa [#allocation6], 1 }
 0x115   :  { %158 = vsyncpa [#allocation4], 1 }

</bundles_post_ra>
